<compile_context>
chip_gen: v7x
topology: tpu7x:2x2x1
jax: 0.10.0
libtpu: 0.0.40
codegen_flags: <defaults>
</compile_context>

<pallas_src>
import jax
import jax.numpy as jnp
from jax.experimental import pallas as pl
from jax.experimental.pallas import tpu as pltpu


# ----------------------------------------------------------------------------
# Kernel: relu(x @ w1 + b1) @ w2f + b2f   (w2f/b2f already fused with the conv)
# ----------------------------------------------------------------------------
def _mlp_fused_kernel(x_ref, w1_ref, b1_ref, w2f_ref, b2f_ref, o_ref):
    h1 = jnp.dot(x_ref[...], w1_ref[...], preferred_element_type=jnp.float32)
    h1 = jnp.maximum(h1 + b1_ref[...], 0.0)
    o_ref[...] = (
        jnp.dot(h1, w2f_ref[...], preferred_element_type=jnp.float32) + b2f_ref[...]
    ).astype(o_ref.dtype)


# ----------------------------------------------------------------------------
# Helpers
# ----------------------------------------------------------------------------
def _round_up(x, m):
    return -(-x // m) * m


def _sublane(dtype):
    # Sublane packing multiple for the second-to-last dim.
    return {4: 8, 2: 16, 1: 32}.get(jnp.dtype(dtype).itemsize, 8)


def _tpu_plan():
    """Generation-aware VMEM budget / tile target / step-count preference."""
    try:
        kind = jax.devices()[0].device_kind.lower()
    except Exception:  # pragma: no cover - CPU/interpret fallback
        kind = ""
    is_v7 = ("v7" in kind) or ("7x" in kind)
    two_tc = is_v7 or ("v5p" in kind) or (("v4" in kind) and ("lite" not in kind))
    if is_v7:
        # 64 MiB physical VMEM per TensorCore: budget conservatively.
        return dict(vmem_budget=32 << 20, vmem_limit=40 << 20,
                    target_tile_m=8192, prefer_even_steps=True)
    if any(tag in kind for tag in ("v6", "v5", "v4", "v3")):
        # 128 MiB physical VMEM: raise the scoped default (16/32 MiB).
        return dict(vmem_budget=56 << 20, vmem_limit=64 << 20,
                    target_tile_m=4096, prefer_even_steps=two_tc)
    # Unknown device: stay within the common 32 MiB scoped default.
    return dict(vmem_budget=24 << 20, vmem_limit=None,
                target_tile_m=4096, prefer_even_steps=two_tc)


def _pallas_mlp(xm, w1, b1, w2f, b2f, plan):
    """xm: [M, ch] -> [M, out_pad] via the fused MLP kernel."""
    M, ch = xm.shape
    H1 = w1.shape[1]
    out_pad = w2f.shape[1]
    sub = _sublane(xm.dtype)
    itemsize = jnp.dtype(xm.dtype).itemsize

    # Double-buffered VMEM bytes per tiled row.  The x block is lane-padded
    # ch -> multiple of 128 in VMEM (HBM traffic is NOT inflated, only the
    # VMEM footprint); the output block is out_pad lanes wide.
    row_bytes = 2 * (_round_up(ch, 128) + out_pad) * itemsize
    # Resident f32 weights (default double-buffered; tiny, so no Buffered(1)).
    weight_bytes = 2 * 4 * (
        _round_up(ch, 8) * _round_up(H1, 128)
        + 8 * _round_up(H1, 128)
        + _round_up(H1, 8) * out_pad
        + 8 * out_pad
    )
    headroom = 2 << 20
    budget_rows = max(sub, (plan["vmem_budget"] - weight_bytes - headroom) // row_bytes)
    max_tile = max(sub, min(plan["target_tile_m"], (budget_rows // sub) * sub))

    Mp = _round_up(M, sub)
    if Mp <= max_tile:
        # One well-filled step on 1-TC parts; split in two only when there is
        # enough work to keep both TensorCores of a 2-TC part busy.
        steps = 2 if (plan["prefer_even_steps"] and Mp >= 2048) else 1
    else:
        steps = -(-Mp // max_tile)
        if plan["prefer_even_steps"] and steps % 2:
            steps += 1
    tile_m = _round_up(-(-Mp // steps), sub)
    Mp = steps * tile_m
    if Mp != M:
        xm = jnp.pad(xm, ((0, Mp - M), (0, 0)))

    cp_kwargs = dict(dimension_semantics=("parallel",))
    if plan["vmem_limit"] is not None:
        cp_kwargs["vmem_limit_bytes"] = plan["vmem_limit"]

    y = pl.pallas_call(
        _mlp_fused_kernel,
        out_shape=jax.ShapeDtypeStruct((Mp, out_pad), xm.dtype),
        grid_spec=pltpu.PrefetchScalarGridSpec(
            num_scalar_prefetch=0,
            grid=(steps,),
            in_specs=[
                pl.BlockSpec((tile_m, ch), lambda i: (i, 0)),
                pl.BlockSpec((ch, H1), lambda i: (0, 0)),
                pl.BlockSpec((1, H1), lambda i: (0, 0)),
                pl.BlockSpec((H1, out_pad), lambda i: (0, 0)),
                pl.BlockSpec((1, out_pad), lambda i: (0, 0)),
            ],
            out_specs=pl.BlockSpec((tile_m, out_pad), lambda i: (i, 0)),
        ),
        compiler_params=pltpu.CompilerParams(**cp_kwargs),
    )(xm, w1, b1.reshape(1, H1), w2f, b2f)
    return y[:M]


def _fold_scatter(cols, C, k, H, W, stride):
    """General nn.Fold: cols [n, C*k*k, L] -> [n, C, H, W] (sums overlaps)."""
    n, ckk, L = cols.shape
    nb_h = (H - k) // stride + 1
    nb_w = (W - k) // stride + 1
    assert L == nb_h * nb_w, "L must match number of fold blocks"
    c6 = cols.reshape(n, C, k, k, nb_h, nb_w)
    out = jnp.zeros((n, C, H, W), cols.dtype)
    rows = jnp.arange(nb_h) * stride
    colw = jnp.arange(nb_w) * stride
    for kh in range(k):
        for kw in range(k):
            out = out.at[:, :, (rows + kh)[:, None], (colw + kw)[None, :]].add(
                c6[:, :, kh, kw]
            )
    return out


def init_params(key, ch, kernel_size):
    k = kernel_size
    lin1_out = ch // k * (k * k)
    H1 = lin1_out // 2
    H2 = lin1_out
    conv_ch_in = ch // k
    k1, k2, k3, k4, k5 = jax.random.split(key, 5)

    def unif(kk, shape, fan_in):
        bound = 1.0 / float(fan_in) ** 0.5
        return jax.random.uniform(kk, shape, jnp.float32, -bound, bound)

    return {
        "w1": unif(k1, (ch, H1), ch),                  # linear1.weight^T
        "b1": unif(k2, (H1,), ch),                     # linear1.bias
        "w2": unif(k3, (H1, H2), H1),                  # linear2.weight^T
        "b2": unif(k4, (H2,), H1),                     # linear2.bias
        "wc": unif(k5, (ch, conv_ch_in), conv_ch_in),  # conv.weight squeezed [out, in]
    }


# ----------------------------------------------------------------------------
# Forward
# ----------------------------------------------------------------------------
def neural_conv_recon_forward(x, params, *, ch, resolution, kernel_size,
                              use_pallas=None, pallas_min_rows=1024):
    n, L, c = x.shape
    assert c == ch
    k = kernel_size
    stride = 3  # nn.Fold stride hardcoded in the module
    conv_ch_in = ch // k
    w1, b1, w2, b2, wc = (params["w1"], params["b1"], params["w2"],
                          params["b2"], params["wc"])
    H1 = w1.shape[1]
    out_feat = ch * k * k

    # --- trace-time fusion of linear2 with the 1x1 conv (exact; changes only
    #     the FP32 accumulation order vs PyTorch, ~1e-6 drift) ---------------
    eye = jnp.eye(k * k, dtype=wc.dtype)
    wbig = jnp.einsum("oi,pq->ipoq", wc, eye).reshape(conv_ch_in * k * k, out_feat)
    w2f = w2 @ wbig                       # [H1, out_feat]
    b2f = (b2 @ wbig).reshape(1, out_feat)

    M = n * L
    if use_pallas is None:
        # Small-M: the pallas_call launch + per-step overhead dominates; a
        # fused XLA path matches or beats the kernel below this threshold.
        use_pallas = M >= pallas_min_rows
    xm = x.reshape(M, ch)

    if use_pallas:
        plan = _tpu_plan()
        out_pad = _round_up(out_feat, 128)     # lane-dense stores
        if out_pad != out_feat:
            w2f_p = jnp.pad(w2f, ((0, 0), (0, out_pad - out_feat)))
            b2f_p = jnp.pad(b2f, ((0, 0), (0, out_pad - out_feat)))
        else:
            w2f_p, b2f_p = w2f, b2f
        y = _pallas_mlp(xm, w1, b1, w2f_p, b2f_p, plan)[:, :out_feat]
    else:
        y = jnp.maximum(xm @ w1 + b1, 0.0) @ w2f + b2f

    nb_h = (resolution - k) // stride + 1
    nb_w = (resolution - k) // stride + 1

    if stride == k and nb_h * k == resolution and nb_w * k == resolution:
        # Non-overlapping fold == pure relayout (XLA fuses slice+reshape+
        # transpose into a single copy):
        # out[n, c, bh*k+kh, bw*k+kw] = y[(n, bh, bw), c*k*k + kh*k + kw]
        y6 = y.reshape(n, nb_h, nb_w, ch, k, k)
        return jnp.transpose(y6, (0, 3, 1, 4, 2, 5)).reshape(
            n, ch, resolution, resolution)

    # Overlapping fold (scatter-add data movement) stays in JAX glue.
    cols = jnp.transpose(y.reshape(n, L, out_feat), (0, 2, 1))
    return _fold_scatter(cols, ch, k, resolution, resolution, stride=stride)


def _reference(x, params, *, ch, resolution, kernel_size):
    """Pure-JAX reference mirroring the PyTorch forward (unfused, scatter fold)."""
    k = kernel_size
    n, L, c = x.shape
    h1 = jnp.maximum(x.reshape(-1, c) @ params["w1"] + params["b1"], 0.0)
    h2 = h1 @ params["w2"] + params["b2"]
    h2 = h2.reshape(n * L, ch // k, k, k)
    conv = jnp.einsum("oi,bikl->bokl", params["wc"], h2)
    cols = jnp.transpose(conv.reshape(n, L, ch * k * k), (0, 2, 1))
    return _fold_scatter(cols, ch, k, resolution, resolution, stride=3)


if __name__ == "__main__":
    # Shapes consistent with the module:
    # ch=12, kernel_size=3, resolution=12 -> L = ((12-3)//3 + 1)^2 = 16
    ch, kernel_size, resolution = 12, 3, 12
    L = ((resolution - kernel_size) // 3 + 1) ** 2

    key = jax.random.PRNGKey(0)
    kx1, kx2, kp = jax.random.split(key, 3)
    params = init_params(kp, ch, kernel_size)

    # 1) Small shape (the module's typical size): force the Pallas path so the
    #    kernel itself is exercised and checked against the unfused reference.
    n1 = 2
    x1 = jax.random.normal(kx1, (n1, L, ch), dtype=jnp.float32)
    out1 = jax.block_until_ready(
        neural_conv_recon_forward(x1, params, ch=ch, resolution=resolution,
                                  kernel_size=kernel_size, use_pallas=True))
    ref1 = _reference(x1, params, ch=ch, resolution=resolution,
                      kernel_size=kernel_size)
    assert out1.shape == (n1, ch, resolution, resolution), out1.shape
    assert jnp.allclose(out1, ref1, atol=1e-5, rtol=1e-5), "mismatch (small)"

    # 2) Larger batch: auto-dispatch picks the Pallas path (M = 2048) and the
    #    multi-step / 2-TC tiling logic is exercised.
    n2 = 128
    x2 = jax.random.normal(kx2, (n2, L, ch), dtype=jnp.float32)
    out2 = jax.block_until_ready(
        neural_conv_recon_forward(x2, params, ch=ch, resolution=resolution,
                                  kernel_size=kernel_size))
    ref2 = _reference(x2, params, ch=ch, resolution=resolution,
                      kernel_size=kernel_size)
    assert out2.shape == (n2, ch, resolution, resolution), out2.shape
    assert jnp.allclose(out2, ref2, atol=1e-4, rtol=1e-4), "mismatch (large)"

    print("KERNEL_OK")
</pallas_src>

<mosaic_0001>
module attributes {stable_mosaic.version = 11 : i64} {
  func.func @_mlp_fused_kernel(%arg0: i32, %arg1: memref<32x12xf32, #tpu.memory_space<vmem>>, %arg2: memref<12x18xf32, #tpu.memory_space<vmem>>, %arg3: memref<1x18xf32, #tpu.memory_space<vmem>>, %arg4: memref<18x128xf32, #tpu.memory_space<vmem>>, %arg5: memref<1x128xf32, #tpu.memory_space<vmem>>, %arg6: memref<32x128xf32, #tpu.memory_space<vmem>>) attributes {dimension_semantics = [#tpu.dimension_semantics<parallel>], iteration_bounds = array<i64: 1>, scalar_prefetch = 0 : i64, scratch_operands = 0 : i64, tpu.core_type = #tpu.core_type<tc>, window_params = [{transform_indices = @transform_0, window_bounds = array<i64: 32, 12>}, {pipeline_mode = #tpu.pipeline_mode<synchronous>, transform_indices = @transform_1, window_bounds = array<i64: 12, 18>}, {pipeline_mode = #tpu.pipeline_mode<synchronous>, transform_indices = @transform_2, window_bounds = array<i64: 1, 18>}, {pipeline_mode = #tpu.pipeline_mode<synchronous>, transform_indices = @transform_3, window_bounds = array<i64: 18, 128>}, {pipeline_mode = #tpu.pipeline_mode<synchronous>, transform_indices = @transform_4, window_bounds = array<i64: 1, 128>}, {transform_indices = @transform_5, window_bounds = array<i64: 32, 128>}]} {
    %c0 = arith.constant 0 : index
    %c0_0 = arith.constant 0 : index
    %0 = vector.load %arg1[%c0, %c0_0] : memref<32x12xf32, #tpu.memory_space<vmem>>, vector<32x12xf32>
    %c0_1 = arith.constant 0 : index
    %c0_2 = arith.constant 0 : index
    %1 = vector.load %arg2[%c0_1, %c0_2] : memref<12x18xf32, #tpu.memory_space<vmem>>, vector<12x18xf32>
    %cst = arith.constant dense<0.000000e+00> : vector<32x18xf32>
    %2 = tpu.matmul %0, %1, %cst {dimension_numbers = #tpu.dot_dimension_numbers<[1], [0], [0], [1], [0, 0, 1, 1], [], []>} : vector<32x12xf32>, vector<12x18xf32>, vector<32x18xf32> -> vector<32x18xf32>
    %c0_3 = arith.constant 0 : index
    %c0_4 = arith.constant 0 : index
    %3 = vector.load %arg3[%c0_3, %c0_4] : memref<1x18xf32, #tpu.memory_space<vmem>>, vector<1x18xf32>
    %4 = vector.broadcast %3 : vector<1x18xf32> to vector<32x18xf32>
    %5 = arith.addf %2, %4 : vector<32x18xf32>
    %cst_5 = arith.constant 0.000000e+00 : f32
    %6 = vector.broadcast %cst_5 : f32 to vector<32x18xf32>
    %7 = arith.maximumf %5, %6 : vector<32x18xf32>
    %c0_6 = arith.constant 0 : index
    %c0_7 = arith.constant 0 : index
    %8 = vector.load %arg4[%c0_6, %c0_7] : memref<18x128xf32, #tpu.memory_space<vmem>>, vector<18x128xf32>
    %cst_8 = arith.constant dense<0.000000e+00> : vector<32x128xf32>
    %9 = tpu.matmul %7, %8, %cst_8 {dimension_numbers = #tpu.dot_dimension_numbers<[1], [0], [0], [1], [0, 0, 1, 1], [], []>} : vector<32x18xf32>, vector<18x128xf32>, vector<32x128xf32> -> vector<32x128xf32>
    %c0_9 = arith.constant 0 : index
    %c0_10 = arith.constant 0 : index
    %10 = vector.load %arg5[%c0_9, %c0_10] : memref<1x128xf32, #tpu.memory_space<vmem>>, vector<1x128xf32>
    %11 = vector.broadcast %10 : vector<1x128xf32> to vector<32x128xf32>
    %12 = arith.addf %9, %11 : vector<32x128xf32>
    %c0_11 = arith.constant 0 : index
    %c0_12 = arith.constant 0 : index
    %13 = vector.load %arg6[%c0_11, %c0_12] : memref<32x128xf32, #tpu.memory_space<vmem>>, vector<32x128xf32>
    tpu.vector_store %arg6[%c0_11, %c0_12], %12 {strides = array<i32>} : memref<32x128xf32, #tpu.memory_space<vmem>>, vector<32x128xf32>,
    return
  }
  func.func @transform_0(%arg0: i32) -> (i32, i32) {
    %c0_i32 = arith.constant 0 : i32
    %c0_i32_0 = arith.constant 0 : i32
    return %arg0, %c0_i32 : i32, i32
  }
  func.func @transform_1(%arg0: i32) -> (i32, i32) {
    %c0_i32 = arith.constant 0 : i32
    %c0_i32_0 = arith.constant 0 : i32
    %c0_i32_1 = arith.constant 0 : i32
    return %c0_i32, %c0_i32_0 : i32, i32
  }
  func.func @transform_2(%arg0: i32) -> (i32, i32) {
    %c0_i32 = arith.constant 0 : i32
    %c0_i32_0 = arith.constant 0 : i32
    %c0_i32_1 = arith.constant 0 : i32
    return %c0_i32, %c0_i32_0 : i32, i32
  }
  func.func @transform_3(%arg0: i32) -> (i32, i32) {
    %c0_i32 = arith.constant 0 : i32
    %c0_i32_0 = arith.constant 0 : i32
    %c0_i32_1 = arith.constant 0 : i32
    return %c0_i32, %c0_i32_0 : i32, i32
  }
  func.func @transform_4(%arg0: i32) -> (i32, i32) {
    %c0_i32 = arith.constant 0 : i32
    %c0_i32_0 = arith.constant 0 : i32
    %c0_i32_1 = arith.constant 0 : i32
    return %c0_i32, %c0_i32_0 : i32, i32
  }
  func.func @transform_5(%arg0: i32) -> (i32, i32) {
    %c0_i32 = arith.constant 0 : i32
    %c0_i32_0 = arith.constant 0 : i32
    return %arg0, %c0_i32 : i32, i32
  }
}

</mosaic_0001>

<bundles_post_ra>
// kernel: tpu_custom_call.1
= control target key start
LH: loop header
LB: loop body
LE: loop exit
PB: predicated region body
PF: predicated region fallthrough
CT: control target
= control target key end

     0   :  { %vm47_vm0 = vcmask 1043456   ;;  %vm357_vm1 = vmmov 1   ;;  %vm34_vm3 = vcmask 97280   ;;  %s436_s0 = inlined_call_operand.vmem [shape: f32[32,12], index: 0, kind: input, shape index: {}]   ;;  %s437_s1 = inlined_call_operand.vmem [shape: f32[12,18], index: 1, kind: input, shape index: {}]   ;;  %s438_s2 = inlined_call_operand.vmem [shape: f32[1,18], index: 2, kind: input, shape index: {}]   ;;  %s439_s3 = inlined_call_operand.vmem [shape: f32[18,128], index: 3, kind: input, shape index: {}]   ;;  %s440_s4 = inlined_call_operand.vmem [shape: f32[1,128], index: 4, kind: input, shape index: {}]   ;;  %s441_s5 = inlined_call_operand.hbm [shape: f32[32,128], index: 5, kind: output, shape index: {}]  }
   0x1   :  { %v25_v0 = vld [vmem:[%s437_s1] sm:$0xff]  ;;  %v26_v1 = vld [vmem:[%s437_s1 + $0x8] sm:$0xf]  ;;  %vm320_vm2 = vmpackc.low %vm47_vm0, %vm357_vm1 }
   0x2   :  { %v21_v2 = vld [vmem:[%s436_s0] sm:$0xff]  ;;  %v319_v3 = vpack.c.bf16 %v26_v1, %v25_v0 }
   0x3   :  { %301 = vmatprep.mubr.msk.f32.mxu0 %vm34_vm3, %v21_v2 }
   0x4   :  { %10 = vsyncpa [#allocation3], 0  ;;  %321 = vmatprep.subr.msk.bf16.mxu0 %vm320_vm2, %v319_v3  ;;  %v22_v4 = vld [vmem:[%s436_s0 + $0x8] sm:$0xff]  ;;  %v23_v5 = vld [vmem:[%s436_s0 + $0x10] sm:$0xff]  ;;  %vm163_vm4 = vcmask 1041408   ;;  %vm150_vm5 = vcmask 146432  }
   0x5   :  { %324 = vmatpush3.bf16.msk.msra.mxu0 %vm320_vm2, %v319_v3  ;;  %v24_v6 = vld [vmem:[%s436_s0 + $0x18] sm:$0xff]  ;;  %v140_v7 = vld [vmem:[%s439_s3] sm:$0xff]  ;;  %v141_v8 = vld [vmem:[%s439_s3 + $0x8] sm:$0xff] }
   0x6   :  { %v325_v9 = vpack.c.bf16 %v141_v8, %v140_v7  ;;  %v142_v10 = vld [vmem:[%s439_s3 + $0x10] sm:$0x3]  ;;  %v272_v11 = vld [vmem:[%s438_s2] ss:$0 sm:$0xff]  ;;  %s358_s2 = smov [#allocation2]  }
   0x7   :  { %v278_v24 = vld [vmem:[%s440_s4] ss:$0 sm:$0xff]  ;;  %s261_s12 = sshll.u32 %s358_s2, 4  ;;  %s262_s12 = int_to_ptr.vmem [resolvable:$true] %s261_s12 }
   0x8   :  { %302 = vmatmul.mubr.msk.f32.vlgmr.msra.gmra.mrb[0].mxu0 %vm34_vm3, %v22_v4  ;;  %326 = vmatprep.subr.bf16.mxu1 %v325_v9  ;;  %s333_s13 = scalar_lea.vmem %s262_s12, 512  ;;  %p338_p1 = scmp.lt.s32.totalorder %s262_s12, %s262_s12 }
   0x9   :  { %304 = vmatprep.mubr.msk.f32.mxu0 %vm34_vm3, %v23_v5  ;;  %328 = vmatpush3.bf16.msra.mxu1 %v325_v9  ;;  %p334_p0 = scmp.ne.s32.totalorder %s262_s12, %s333_s13  ;;  %p339_p2 = scmp.lt.s32.totalorder %s333_s13, %s333_s13 }
   0xa   :  { %311 = vmatprep.subr.msk.mxu1 %vm163_vm4, %v142_v10 }
   0xb   :  { %p340_p3 = por %p339_p2, %p338_p1 }
   0xc   :  { %305 = vmatmul.mubr.msk.f32.gmra.mrb[2].mxu0 %vm34_vm3, %v24_v6 }
   0xd   :  { %312 = vmatpush3.msk.msra.mxu1 %vm163_vm4, %v142_v10  ;;  %p341_p4 = pnand %p340_p3, %p334_p0 }
  0xdb   :  { %v303_v12 = vpop.f32.mrb[0].mxu0 }
  0xdc   :  { %v123_v13 = vadd.f32 %v303_v12, %v272_v11  ;;  %v117_v14 = vpop.f32.mrb[1].mxu0 }
  0xdd   :  { %v118_v15 = vadd.f32 %v272_v11, %v117_v14 }
  0xde   :  { %v137_v18 = vmax.f32 %v123_v13, 0.0 }
  0xdf   :  { %v136_v16 = vmax.f32 %v118_v15, 0.0  ;;  %v306_v17 = vpop.f32.mrb[2].mxu0 }
  0xe0   :  { %v133_v19 = vadd.f32 %v306_v17, %v272_v11  ;;  %v127_v20 = vpop.f32.mrb[3].mxu0 }
  0xe1   :  { %v128_v21 = vadd.f32 %v272_v11, %v127_v20  ;;  %313 = vmatprep.mubr.msk.f32.mxu1 %vm150_vm5, %v136_v16 }
  0xe2   :  { %314 = vmatmul.mubr.msk.f32.vlgmr.msra.gmra.mrb[0].mxu1 %vm150_vm5, %v137_v18  ;;  %v139_v23 = vmax.f32 %v133_v19, 0.0 }
  0xe3   :  { %v138_v22 = vmax.f32 %v128_v21, 0.0 }
  0xe5   :  { %316 = vmatprep.mubr.msk.f32.mxu1 %vm150_vm5, %v138_v22 }
  0xe6   :  { %317 = vmatmul.mubr.msk.f32.gmra.mrb[2].mxu1 %vm150_vm5, %v139_v23 }
 0x1b5   :  { %v315_v25 = vpop.f32.mrb[0].mxu1 }
 0x1b6   :  { %v239_v26 = vadd.f32 %v315_v25, %v278_v24  ;;  %v233_v27 = vpop.f32.mrb[1].mxu1 }
 0x1b7   :  { %v234_v28 = vadd.f32 %v278_v24, %v233_v27 }
 0x1b8   :  { %253 = vst [vmem:[#allocation2 + $0x8] sm:$0xff] %v239_v26 }
 0x1b9   :  { %252 = vst [vmem:[#allocation2] sm:$0xff] %v234_v28  ;;  %v318_v29 = vpop.f32.mrb[2].mxu1 }
 0x1ba   :  { %v249_v30 = vadd.f32 %v318_v29, %v278_v24  ;;  %v243_v31 = vpop.f32.mrb[3].mxu1 }
 0x1bb   :  { %v244_v32 = vadd.f32 %v278_v24, %v243_v31 }
 0x1bc   :  { %255 = vst [vmem:[#allocation2 + $0x18] sm:$0xff] %v249_v30 }
 0x1bd   :  { %254 = vst [vmem:[#allocation2 + $0x10] sm:$0xff] %v244_v32 }
 0x1be   :  { %344 = shalt.err (!%p341_p4)
}
 0x1bf   :  { %s345_s15 = scalar_lea.hbm %s441_s5, 512 }
 0x1c0   :  { %p346_p5 = scmp.ne.s32.totalorder %s441_s5, %s345_s15  ;;  %p349_p6 = scmp.lt.u32.totalorder %s345_s15, %s441_s5 }
 0x1c2   :  { %p351_p7 = pnand %p349_p6, %p346_p5 }
 0x1c4   :  { %354 = shalt.err (!%p351_p7)
}
 0x1c5   :  { %s359_s20 = smov 128   ;;  %s360_s21 = smov 8  }
 0x1c6   :  { %267 = dma.vmem_to_hbm [thread:$0]  %s262_s12, 512, %s441_s5, [#allocation3], %s359_s20, %s359_s20, %s360_s21  }
 0x1c7   :  { %355 = dma.done.wait [#allocation3], 512  }
 0x1c8   :  { %356 = vsyncadd [#allocation3], 4294966784 }
 0x1c9   :  { %271 = vsyncpa [#allocation3], 1 }

</bundles_post_ra>
